<compile_context>
chip_gen: v6e
topology: v6e:2x2x1
jax: 0.10.0
libtpu: 0.0.40
codegen_flags: <defaults>
</compile_context>

<pallas_src>
import jax
import jax.numpy as jnp
from jax.experimental import pallas as pl
from jax.experimental.pallas import tpu as pltpu

# ------------------------- model hyper-parameters -------------------------
BSZ = 2
SQLEN = 8
HIDDEN_SIZE = 32
NUM_HEADS = 4
HEAD_DIM = HIDDEN_SIZE // NUM_HEADS            # 8 (rot_dim == head_dim -> no pass-through)
MAX_POS_EMB = 32
EPS = 1e-6                                     # Qwen RMSNorm layer_norm_epsilon

M = BSZ * SQLEN                                # flattened rows = 16
WPAD = ((3 * HIDDEN_SIZE + 127) // 128) * 128  # qkv slab padded to a 128-lane multiple


# ------------------------------- kernel -----------------------------------
def pre_attn_kernel(x_ref, cos_ref, sinf_ref, sins_ref, g_ref, w_ref, b_ref, out_ref):
    H = HIDDEN_SIZE
    D = HEAD_DIM

    x = x_ref[...].astype(jnp.float32)                         # (TM, H)

    # ---- RMSNorm (ln_1) ----
    var = jnp.mean(x * x, axis=-1, keepdims=True)
    xn = x * jax.lax.rsqrt(var + EPS) * g_ref[...]             # (TM, H)

    # ---- fused qkv projection (weight/bias zero-padded to WPAD lanes) ----
    mixed = jnp.dot(xn, w_ref[...], preferred_element_type=jnp.float32) + b_ref[...]  # (TM, WPAD)

    # ---- RoPE on q/k lanes ----
    # rotate_half(t) = [-t2, t1] per head.  Expressed as two whole-slab lane rolls:
    #   fwd[:, i] = mixed[:, i + D/2]   (partner for first-half lanes)
    #   bwd[:, i] = mixed[:, i - D/2]   (partner for second-half lanes)
    # The minus sign and the head/half masking are folded into the precomputed sin
    # tables (sinf: -sin on first-half q/k lanes, else 0; sins: +sin on second-half
    # q/k lanes, else 0).  v and pad lanes have cos = 1, sin = 0, so they pass through.
    fwd = pltpu.roll(mixed, WPAD - D // 2, axis=1)
    bwd = pltpu.roll(mixed, D // 2, axis=1)
    out = mixed * cos_ref[...] + fwd * sinf_ref[...] + bwd * sins_ref[...]

    out_ref[...] = out.astype(out_ref.dtype)


# ------------------------------- wrapper -----------------------------------
def qwen_pre_attn_block(hidden_states, position_ids, ln1_weight, c_attn_w, c_attn_b,
                        cos_emb, sin_emb):
    """hidden_states: (B, S, H); position_ids: (B, S) i32.
       Returns (query, key, value), each (B, S, NUM_HEADS, HEAD_DIM)."""
    B, S, H = hidden_states.shape
    D = HEAD_DIM
    Mrows = B * S

    # glue: position-id gather of rotary tables (cos_emb[position_ids]), plain JAX.
    cos_pos = jnp.take(cos_emb, position_ids, axis=0).reshape(Mrows, D)    # (M, D)
    sin_pos = jnp.take(sin_emb, position_ids, axis=0).reshape(Mrows, D)

    # Pre-expand cos/sin to the full padded lane width; fold rotate_half sign + masks
    # into the sin tables so the kernel needs no tile/slice/concat for RoPE.
    lane = jnp.arange(WPAD)
    j = lane % D
    is_qk = lane < 2 * H
    is_first = is_qk & (j < D // 2)
    is_second = is_qk & (j >= D // 2)
    cos_g = jnp.take(cos_pos, j, axis=1)                                   # (M, WPAD)
    sin_g = jnp.take(sin_pos, j, axis=1)
    cos_full = jnp.where(is_qk, cos_g, 1.0).astype(jnp.float32)
    sin_first = jnp.where(is_first, -sin_g, 0.0).astype(jnp.float32)
    sin_second = jnp.where(is_second, sin_g, 0.0).astype(jnp.float32)

    x2d = hidden_states.reshape(Mrows, H)
    g2d = ln1_weight.reshape(1, H).astype(jnp.float32)
    w_pad = jnp.pad(c_attn_w.astype(jnp.float32), ((0, 0), (0, WPAD - 3 * H)))
    b_pad = jnp.pad(c_attn_b.astype(jnp.float32), (0, WPAD - 3 * H)).reshape(1, WPAD)

    TM = Mrows                 # one grid step at these sizes (raise toward 128 rows/tile
    grid = (Mrows // TM,)      # before adding grid steps when B*S grows)

    out = pl.pallas_call(
        pre_attn_kernel,
        out_shape=jax.ShapeDtypeStruct((Mrows, WPAD), hidden_states.dtype),
        grid_spec=pltpu.PrefetchScalarGridSpec(
            num_scalar_prefetch=0,
            grid=grid,
            in_specs=[
                pl.BlockSpec((TM, H), lambda i: (i, 0)),        # x
                pl.BlockSpec((TM, WPAD), lambda i: (i, 0)),     # cos (expanded)
                pl.BlockSpec((TM, WPAD), lambda i: (i, 0)),     # -sin on first halves
                pl.BlockSpec((TM, WPAD), lambda i: (i, 0)),     # +sin on second halves
                pl.BlockSpec((1, H), lambda i: (0, 0)),         # ln_1 weight
                pl.BlockSpec((H, WPAD), lambda i: (0, 0)),      # c_attn weight (padded)
                pl.BlockSpec((1, WPAD), lambda i: (0, 0)),      # c_attn bias (padded)
            ],
            out_specs=pl.BlockSpec((TM, WPAD), lambda i: (i, 0)),
        ),
        compiler_params=pltpu.CompilerParams(dimension_semantics=("parallel",)),
    )(x2d, cos_full, sin_first, sin_second, g2d, w_pad, b_pad)

    # wrapper-side layout plumbing: split the fused slab and reshape to heads.
    q = out[:, 0 * H:1 * H].reshape(B, S, NUM_HEADS, D)
    k = out[:, 1 * H:2 * H].reshape(B, S, NUM_HEADS, D)
    v = out[:, 2 * H:3 * H].reshape(B, S, NUM_HEADS, D)
    return q, k, v


# -------------------------- pure-JAX reference ------------------------------
def ref_forward(hidden_states, position_ids, ln1_weight, c_attn_w, c_attn_b,
                cos_emb, sin_emb):
    B, S, H = hidden_states.shape
    cos = jnp.take(cos_emb, position_ids, axis=0)[:, :, None, :]   # (B,S,1,D)
    sin = jnp.take(sin_emb, position_ids, axis=0)[:, :, None, :]
    var = jnp.mean(hidden_states ** 2, axis=-1, keepdims=True)
    xn = hidden_states * jax.lax.rsqrt(var + EPS) * ln1_weight
    mixed = xn @ c_attn_w + c_attn_b
    q, k, v = jnp.split(mixed, 3, axis=-1)
    q = q.reshape(B, S, NUM_HEADS, HEAD_DIM)
    k = k.reshape(B, S, NUM_HEADS, HEAD_DIM)
    v = v.reshape(B, S, NUM_HEADS, HEAD_DIM)

    def rot_half(t):
        x1, x2 = jnp.split(t, 2, axis=-1)
        return jnp.concatenate([-x2, x1], axis=-1)

    q = q * cos + rot_half(q) * sin
    k = k * cos + rot_half(k) * sin
    return q, k, v


# ------------------------------- main ---------------------------------------
if __name__ == "__main__":
    key = jax.random.PRNGKey(0)
    k1, k2, k3, k4 = jax.random.split(key, 4)

    hidden_states = jax.random.normal(k1, (BSZ, SQLEN, HIDDEN_SIZE), jnp.float32)
    position_ids = jnp.broadcast_to(jnp.arange(SQLEN, dtype=jnp.int32), (BSZ, SQLEN))

    ln1_weight = 1.0 + 0.05 * jax.random.normal(k2, (HIDDEN_SIZE,), jnp.float32)
    c_attn_w = (jax.random.normal(k3, (HIDDEN_SIZE, 3 * HIDDEN_SIZE), jnp.float32)
                / jnp.sqrt(HIDDEN_SIZE))
    c_attn_b = 0.01 * jax.random.normal(k4, (3 * HIDDEN_SIZE,), jnp.float32)

    # rotary cos/sin tables, built the Qwen way: emb = cat(freqs, freqs), rot_dim == head_dim
    inv_freq = 1.0 / (10000.0 ** (jnp.arange(0, HEAD_DIM, 2, dtype=jnp.float32) / HEAD_DIM))
    pos = jnp.arange(MAX_POS_EMB, dtype=jnp.float32)
    freqs = jnp.einsum("p,f->pf", pos, inv_freq)                 # (MAX_POS, D/2)
    emb = jnp.concatenate([freqs, freqs], axis=-1)               # (MAX_POS, D)
    cos_emb = jnp.cos(emb)
    sin_emb = jnp.sin(emb)

    q, k, v = qwen_pre_attn_block(hidden_states, position_ids, ln1_weight,
                                  c_attn_w, c_attn_b, cos_emb, sin_emb)
    jax.block_until_ready((q, k, v))

    qr, kr, vr = ref_forward(hidden_states, position_ids, ln1_weight,
                             c_attn_w, c_attn_b, cos_emb, sin_emb)
    assert jnp.allclose(q, qr, atol=1e-5, rtol=1e-5)
    assert jnp.allclose(k, kr, atol=1e-5, rtol=1e-5)
    assert jnp.allclose(v, vr, atol=1e-5, rtol=1e-5)

    print("KERNEL_OK")
</pallas_src>

<mosaic_0001>
module attributes {stable_mosaic.version = 11 : i64} {
  func.func @pre_attn_kernel(%arg0: i32, %arg1: memref<16x32xf32, #tpu.memory_space<vmem>>, %arg2: memref<16x128xf32, #tpu.memory_space<vmem>>, %arg3: memref<16x128xf32, #tpu.memory_space<vmem>>, %arg4: memref<16x128xf32, #tpu.memory_space<vmem>>, %arg5: memref<1x32xf32, #tpu.memory_space<vmem>>, %arg6: memref<32x128xf32, #tpu.memory_space<vmem>>, %arg7: memref<1x128xf32, #tpu.memory_space<vmem>>, %arg8: memref<16x128xf32, #tpu.memory_space<vmem>>) attributes {dimension_semantics = [#tpu.dimension_semantics<parallel>], iteration_bounds = array<i64: 1>, scalar_prefetch = 0 : i64, scratch_operands = 0 : i64, tpu.core_type = #tpu.core_type<tc>, window_params = [{transform_indices = @transform_0, window_bounds = array<i64: 16, 32>}, {transform_indices = @transform_1, window_bounds = array<i64: 16, 128>}, {transform_indices = @transform_2, window_bounds = array<i64: 16, 128>}, {transform_indices = @transform_3, window_bounds = array<i64: 16, 128>}, {pipeline_mode = #tpu.pipeline_mode<synchronous>, transform_indices = @transform_4, window_bounds = array<i64: 1, 32>}, {pipeline_mode = #tpu.pipeline_mode<synchronous>, transform_indices = @transform_5, window_bounds = array<i64: 32, 128>}, {pipeline_mode = #tpu.pipeline_mode<synchronous>, transform_indices = @transform_6, window_bounds = array<i64: 1, 128>}, {transform_indices = @transform_7, window_bounds = array<i64: 16, 128>}]} {
    %c0 = arith.constant 0 : index
    %c0_0 = arith.constant 0 : index
    %0 = vector.load %arg1[%c0, %c0_0] : memref<16x32xf32, #tpu.memory_space<vmem>>, vector<16x32xf32>
    %1 = arith.mulf %0, %0 : vector<16x32xf32>
    %cst = arith.constant dense<0.000000e+00> : vector<16xf32>
    %2 = vector.multi_reduction <add>, %1, %cst [1] : vector<16x32xf32> to vector<16xf32>
    %3 = vector.shape_cast %2 : vector<16xf32> to vector<16x1xf32>
    %cst_1 = arith.constant 3.200000e+01 : f32
    %4 = vector.broadcast %cst_1 : f32 to vector<16x1xf32>
    %5 = arith.divf %3, %4 : vector<16x1xf32>
    %cst_2 = arith.constant 9.99999997E-7 : f32
    %6 = vector.broadcast %cst_2 : f32 to vector<16x1xf32>
    %7 = arith.addf %5, %6 : vector<16x1xf32>
    %8 = math.rsqrt %7 : vector<16x1xf32>
    %9 = vector.broadcast %8 : vector<16x1xf32> to vector<16x32xf32>
    %10 = arith.mulf %0, %9 : vector<16x32xf32>
    %c0_3 = arith.constant 0 : index
    %c0_4 = arith.constant 0 : index
    %11 = vector.load %arg5[%c0_3, %c0_4] : memref<1x32xf32, #tpu.memory_space<vmem>>, vector<1x32xf32>
    %12 = vector.broadcast %11 : vector<1x32xf32> to vector<16x32xf32>
    %13 = arith.mulf %10, %12 : vector<16x32xf32>
    %c0_5 = arith.constant 0 : index
    %c0_6 = arith.constant 0 : index
    %14 = vector.load %arg6[%c0_5, %c0_6] : memref<32x128xf32, #tpu.memory_space<vmem>>, vector<32x128xf32>
    %cst_7 = arith.constant dense<0.000000e+00> : vector<16x128xf32>
    %15 = tpu.matmul %13, %14, %cst_7 {dimension_numbers = #tpu.dot_dimension_numbers<[1], [0], [0], [1], [0, 0, 1, 1], [], []>} : vector<16x32xf32>, vector<32x128xf32>, vector<16x128xf32> -> vector<16x128xf32>
    %c0_8 = arith.constant 0 : index
    %c0_9 = arith.constant 0 : index
    %16 = vector.load %arg7[%c0_8, %c0_9] : memref<1x128xf32, #tpu.memory_space<vmem>>, vector<1x128xf32>
    %17 = vector.broadcast %16 : vector<1x128xf32> to vector<16x128xf32>
    %18 = arith.addf %15, %17 : vector<16x128xf32>
    %c124_i32 = arith.constant 124 : i32
    %19 = tpu.dynamic_rotate %18 by %c124_i32 dim 1 : vector<16x128xf32>, i32 -> vector<16x128xf32>
    %c4_i32 = arith.constant 4 : i32
    %20 = tpu.dynamic_rotate %18 by %c4_i32 dim 1 : vector<16x128xf32>, i32 -> vector<16x128xf32>
    %c0_10 = arith.constant 0 : index
    %c0_11 = arith.constant 0 : index
    %21 = vector.load %arg2[%c0_10, %c0_11] : memref<16x128xf32, #tpu.memory_space<vmem>>, vector<16x128xf32>
    %22 = arith.mulf %18, %21 : vector<16x128xf32>
    %c0_12 = arith.constant 0 : index
    %c0_13 = arith.constant 0 : index
    %23 = vector.load %arg3[%c0_12, %c0_13] : memref<16x128xf32, #tpu.memory_space<vmem>>, vector<16x128xf32>
    %24 = arith.mulf %19, %23 : vector<16x128xf32>
    %25 = arith.addf %22, %24 : vector<16x128xf32>
    %c0_14 = arith.constant 0 : index
    %c0_15 = arith.constant 0 : index
    %26 = vector.load %arg4[%c0_14, %c0_15] : memref<16x128xf32, #tpu.memory_space<vmem>>, vector<16x128xf32>
    %27 = arith.mulf %20, %26 : vector<16x128xf32>
    %28 = arith.addf %25, %27 : vector<16x128xf32>
    %c0_16 = arith.constant 0 : index
    %c0_17 = arith.constant 0 : index
    %29 = vector.load %arg8[%c0_16, %c0_17] : memref<16x128xf32, #tpu.memory_space<vmem>>, vector<16x128xf32>
    tpu.vector_store %arg8[%c0_16, %c0_17], %28 {strides = array<i32>} : memref<16x128xf32, #tpu.memory_space<vmem>>, vector<16x128xf32>,
    return
  }
  func.func @transform_0(%arg0: i32) -> (i32, i32) {
    %c0_i32 = arith.constant 0 : i32
    %c0_i32_0 = arith.constant 0 : i32
    return %arg0, %c0_i32 : i32, i32
  }
  func.func @transform_1(%arg0: i32) -> (i32, i32) {
    %c0_i32 = arith.constant 0 : i32
    %c0_i32_0 = arith.constant 0 : i32
    return %arg0, %c0_i32 : i32, i32
  }
  func.func @transform_2(%arg0: i32) -> (i32, i32) {
    %c0_i32 = arith.constant 0 : i32
    %c0_i32_0 = arith.constant 0 : i32
    return %arg0, %c0_i32 : i32, i32
  }
  func.func @transform_3(%arg0: i32) -> (i32, i32) {
    %c0_i32 = arith.constant 0 : i32
    %c0_i32_0 = arith.constant 0 : i32
    return %arg0, %c0_i32 : i32, i32
  }
  func.func @transform_4(%arg0: i32) -> (i32, i32) {
    %c0_i32 = arith.constant 0 : i32
    %c0_i32_0 = arith.constant 0 : i32
    %c0_i32_1 = arith.constant 0 : i32
    return %c0_i32, %c0_i32_0 : i32, i32
  }
  func.func @transform_5(%arg0: i32) -> (i32, i32) {
    %c0_i32 = arith.constant 0 : i32
    %c0_i32_0 = arith.constant 0 : i32
    %c0_i32_1 = arith.constant 0 : i32
    return %c0_i32, %c0_i32_0 : i32, i32
  }
  func.func @transform_6(%arg0: i32) -> (i32, i32) {
    %c0_i32 = arith.constant 0 : i32
    %c0_i32_0 = arith.constant 0 : i32
    %c0_i32_1 = arith.constant 0 : i32
    return %c0_i32, %c0_i32_0 : i32, i32
  }
  func.func @transform_7(%arg0: i32) -> (i32, i32) {
    %c0_i32 = arith.constant 0 : i32
    %c0_i32_0 = arith.constant 0 : i32
    return %arg0, %c0_i32 : i32, i32
  }
}

</mosaic_0001>

<bundles_post_ra>
// kernel: tpu_custom_call.1
= control target key start
LH: loop header
LB: loop body
LE: loop exit
PB: predicated region body
PF: predicated region fallthrough
CT: control target
= control target key end

     0   :  { %12 = vsyncpa [#allocation3], 0  ;;  %s520_s0 = inlined_call_operand.hbm [shape: f32[16,32], index: 0, kind: input, shape index: {}]   ;;  %s521_s1 = inlined_call_operand.hbm [shape: f32[16,128], index: 1, kind: input, shape index: {}]   ;;  %s522_s2 = inlined_call_operand.hbm [shape: f32[16,128], index: 2, kind: input, shape index: {}]   ;;  %s523_s3 = inlined_call_operand.hbm [shape: f32[16,128], index: 3, kind: input, shape index: {}]   ;;  %s524_s4 = inlined_call_operand.vmem [shape: f32[1,32], index: 4, kind: input, shape index: {}]   ;;  %s525_s5 = inlined_call_operand.hbm [shape: f32[32,128], index: 5, kind: input, shape index: {}]   ;;  %s526_s6 = inlined_call_operand.vmem [shape: f32[1,128], index: 6, kind: input, shape index: {}]   ;;  %s527_s7 = inlined_call_operand.hbm [shape: f32[16,128], index: 7, kind: output, shape index: {}]  }
   0x1   :  { %13 = vsyncpa [#allocation6], 0 }
   0x2   :  { %14 = vsyncpa [#allocation9], 0 }
   0x3   :  { %15 = vsyncpa [#allocation4], 0  ;;  %s424_s24 = smov [#allocation5]   ;;  %s425_s26 = smov [#allocation8]  }
   0x4   :  { %s33_s25 = sshll.u32 %s424_s24, 4  ;;  %s57_s27 = sshll.u32 %s425_s26, 4  ;;  %s34_s25 = int_to_ptr.vmem [resolvable:$true] %s33_s25  ;;  %s58_s27 = int_to_ptr.vmem [resolvable:$true] %s57_s27 }
   0x5   :  { %s304_s28 = scalar_lea.vmem %s34_s25, 256  ;;  %p309_p1 = scmp.lt.s32.totalorder %s34_s25, %s34_s25 }
   0x6   :  { %p305_p0 = scmp.ne.s32.totalorder %s34_s25, %s304_s28  ;;  %p310_p2 = scmp.lt.s32.totalorder %s304_s28, %s304_s28 }
   0x8   :  { %p311_p3 = por %p310_p2, %p309_p1 }
   0xa   :  { %p312_p4 = pnand %p311_p3, %p305_p0 }
   0xc   :  { %315 = shalt.err (!%p312_p4)
}
   0xd   :  { %s426_s29 = smov 128   ;;  %s427_s30 = smov 8  }
   0xe   :  { %39 = dma.hbm_to_vmem [thread:$0]  %s521_s1, 256, %s34_s25, [#allocation6], %s426_s29, %s426_s29, %s427_s30  }
   0xf   :  { %s324_s10 = scalar_lea.vmem %s58_s27, 256  ;;  %p329_p6 = scmp.lt.s32.totalorder %s58_s27, %s58_s27 }
  0x10   :  { %p325_p5 = scmp.ne.s32.totalorder %s58_s27, %s324_s10  ;;  %p330_p7 = scmp.lt.s32.totalorder %s324_s10, %s324_s10 }
  0x12   :  { %p331_p8 = por %p330_p7, %p329_p6 }
  0x14   :  { %p332_p9 = pnand %p331_p8, %p325_p5 }
  0x16   :  { %335 = shalt.err (!%p332_p9)
}
  0x17   :  { %63 = dma.hbm_to_vmem [thread:$0]  %s523_s3, 256, %s58_s27, [#allocation9], %s426_s29, %s426_s29, %s427_s30  }
  0x18   :  { %s428_s13 = smov [#allocation2]   ;;  %s429_s15 = smov [#allocation7]  }
  0x19   :  { %s21_s14 = sshll.u32 %s428_s13, 4  ;;  %s45_s16 = sshll.u32 %s429_s15, 4  ;;  %s22_s14 = int_to_ptr.vmem [resolvable:$true] %s21_s14  ;;  %s46_s16 = int_to_ptr.vmem [resolvable:$true] %s45_s16 }
  0x1a   :  { %s344_s1 = scalar_lea.vmem %s22_s14, 256  ;;  %p349_p11 = scmp.lt.s32.totalorder %s22_s14, %s22_s14 }
  0x1b   :  { %p345_p10 = scmp.ne.s32.totalorder %s22_s14, %s344_s1  ;;  %p350_p12 = scmp.lt.s32.totalorder %s344_s1, %s344_s1 }
  0x1d   :  { %p351_p13 = por %p350_p12, %p349_p11 }
  0x1f   :  { %p352_p0 = pnand %p351_p13, %p345_p10 }
  0x21   :  { %355 = shalt.err (!%p352_p0)
}
  0x22   :  { %27 = dma.hbm_to_vmem [thread:$0]  %s520_s0, 256, %s22_s14, [#allocation3], %s426_s29, %s426_s29, %s427_s30  }
  0x23   :  { %s364_s3 = scalar_lea.vmem %s46_s16, 256  ;;  %p369_p2 = scmp.lt.s32.totalorder %s46_s16, %s46_s16 }
  0x24   :  { %p365_p1 = scmp.ne.s32.totalorder %s46_s16, %s364_s3  ;;  %p370_p3 = scmp.lt.s32.totalorder %s364_s3, %s364_s3 }
  0x26   :  { %p371_p4 = por %p370_p3, %p369_p2 }
  0x28   :  { %p372_p5 = pnand %p371_p4, %p365_p1 }
  0x2a   :  { %375 = shalt.err (!%p372_p5)
}
  0x2b   :  { %51 = dma.hbm_to_vmem [thread:$0]  %s522_s2, 256, %s46_s16, [#allocation6], %s426_s29, %s426_s29, %s427_s30  }
  0x2c   :  { %s430_s21 = smov [#allocation10]  }
  0x2d   :  { %s71_s22 = sshll.u32 %s430_s21, 4  ;;  %s72_s22 = int_to_ptr.vmem [resolvable:$true] %s71_s22 }
  0x2e   :  { %s384_s23 = scalar_lea.vmem %s72_s22, 512  ;;  %p389_p7 = scmp.lt.s32.totalorder %s72_s22, %s72_s22 }
  0x2f   :  { %p385_p6 = scmp.ne.s32.totalorder %s72_s22, %s384_s23  ;;  %p390_p8 = scmp.lt.s32.totalorder %s384_s23, %s384_s23 }
  0x31   :  { %p391_p9 = por %p390_p8, %p389_p7 }
  0x33   :  { %p392_p10 = pnand %p391_p9, %p385_p6 }
  0x35   :  { %395 = shalt.err (!%p392_p10)
}
  0x36   :  { %77 = dma.hbm_to_vmem [thread:$0]  %s525_s5, 512, %s72_s22, [#allocation9], %s426_s29, %s426_s29, %s427_s30  }
  0x37   :  { %416 = dma.done.wait [#allocation3], 256  }
  0x38   :  { %417 = vsyncadd [#allocation3], 4294967040 }
  0x39   :  { %418 = dma.done.wait [#allocation6], 512  }
  0x3a   :  { %419 = vsyncadd [#allocation6], 4294966784 }
  0x3b   :  { %420 = dma.done.wait [#allocation9], 768  }
  0x3c   :  { %421 = vsyncadd [#allocation9], 4294966528  ;;  %v95_v0 = vld [vmem:[#allocation2] sm:$0xff]  ;;  %vm99_vm0 = vcmask 261120   ;;  %v96_v1 = vld [vmem:[#allocation2 + $0x8] sm:$0xff]  ;;  %s431_s27 = smov 124  }
  0x3d   :  { %v97_v2 = vmul.f32 %v95_v0, %v95_v0  ;;  %v98_v3 = vmul.f32 %v96_v1, %v96_v1  ;;  %v127_v6 = vld [vmem:[#allocation10 + $0x18] sm:$0xff]  ;;  %v126_v7 = vld [vmem:[#allocation10 + $0x10] sm:$0xff]  ;;  %v125_v8 = vld [vmem:[#allocation10 + $0x8] sm:$0xff] }
  0x3e   :  { %271 = vmatprep.subr.mxu0 %v127_v6  ;;  %v124_v9 = vld [vmem:[#allocation10] sm:$0xff]  ;;  %v229_v29 = vld [vmem:[#allocation7 + $0x8] sm:$0xff]  ;;  %v224_v30 = vld [vmem:[#allocation5] sm:$0xff] }
  0x3f   :  { %v100_v4 = vsel %vm99_vm0, %v97_v2, 0.0  ;;  %v103_v5 = vsel %vm99_vm0, %v98_v3, 0.0  ;;  %272 = vmatpush3.msra.mxu0 %v127_v6  ;;  %v261_v17 = vld [vmem:[%s524_s4] ss:$0 sm:$0xff]  ;;  %s432_s4 = smov 4   ;;  %v225_v32 = vld [vmem:[#allocation5 + $0x8] sm:$0xff] }
  0x40   :  { %101 = vadd.xlane.f32.xlu0 %v100_v4  ;;  %273 = vmatprep.subr.mxu0 %v126_v7  ;;  %v262_v23 = vld [vmem:[%s526_s6] ss:$0 sm:$0xff]  ;;  %v234_v33 = vld [vmem:[#allocation8] sm:$0xff]  ;;  %v235_v39 = vld [vmem:[#allocation8 + $0x8] sm:$0xff]  ;;  %s433_s6 = smov [#allocation11]  }
  0x41   :  { %274 = vmatpush3.msra.mxu0 %v126_v7  ;;  %v228_v31 = vld [vmem:[#allocation7] sm:$0xff]  ;;  %s247_s28 = sshll.u32 %s433_s6, 4  ;;  %s248_s28 = int_to_ptr.vmem [resolvable:$true] %s247_s28 }
  0x42   :  { %275 = vmatprep.subr.mxu0 %v125_v8  ;;  %s396_s8 = scalar_lea.vmem %s248_s28, 256  ;;  %p401_p12 = scmp.lt.s32.totalorder %s248_s28, %s248_s28 }
  0x43   :  { %276 = vmatpush3.msra.mxu0 %v125_v8  ;;  %p397_p11 = scmp.ne.s32.totalorder %s248_s28, %s396_s8  ;;  %p402_p13 = scmp.lt.s32.totalorder %s396_s8, %s396_s8 }
  0x44   :  { %104 = vadd.xlane.f32.xlu0 %v103_v5  ;;  %277 = vmatprep.subr.mxu0 %v124_v9 }
  0x45   :  { %278 = vmatpush3.msra.mxu0 %v124_v9  ;;  %p403_p0 = por %p402_p13, %p401_p12 }
  0x47   :  { %p404_p1 = pnand %p403_p0, %p397_p11 }
  0xc9   :  { %v102_v10 = vpop.xlane.xlu0 %101 }
  0xca   :  { %v107_v11 = vmul.f32 0.03125, %v102_v10 }
  0xcc   :  { %v109_v12 = vadd.f32 1e-06, %v107_v11 }
  0xcd   :  { %v105_v13 = vpop.xlane.xlu0 %104 }
  0xce   :  { %292 = vrsqrt.f32 %v109_v12  ;;  %v108_v14 = vmul.f32 0.03125, %v105_v13 }
  0xd0   :  { %v110_v15 = vadd.f32 1e-06, %v108_v14 }
  0xd2   :  { %294 = vrsqrt.f32 %v110_v15 }
  0xdb   :  { %v293_v16 = vpop.eup %292 }
  0xdc   :  { %v113_v18 = vmul.f32 %v293_v16, %v95_v0 }
  0xde   :  { %v122_v19 = vmul.f32 %v261_v17, %v113_v18 }
  0xdf   :  { %v295_v20 = vpop.eup %294 }
  0xe0   :  { %v114_v21 = vmul.f32 %v295_v20, %v96_v1  ;;  %279 = vmatprep.mubr.msk.f32.mxu0 %vm99_vm0, %v122_v19 }
  0xe2   :  { %v123_v22 = vmul.f32 %v261_v17, %v114_v21 }
  0xe4   :  { %280 = vmatmul.mubr.msk.f32.vlgmr.msra.gmra.mxu0 %vm99_vm0, %v123_v22 }
 0x1a4   :  { %v281_v24 = vpop.f32.mrf.mxu0 }
 0x1a5   :  { %v213_v25 = vadd.f32 %v281_v24, %v262_v23 }
 0x1a6   :  { %v207_v26 = vpop.f32.mrf.mxu0 }
 0x1a7   :  { %v208_v27 = vadd.f32 %v262_v23, %v207_v26  ;;  %218 = vrot.lane.b32.xlu1 %v213_v25, %s431_s27  ;;  %v227_v40 = vmul.f32 %v225_v32, %v213_v25 }
 0x1a9   :  { %220 = vrot.lane.b32.xlu0 %v208_v27, %s432_s4  ;;  %v226_v37 = vmul.f32 %v224_v30, %v208_v27 }
 0x1ab   :  { %216 = vrot.lane.b32.xlu1 %v208_v27, %s431_s27 }
 0x1af   :  { %222 = vrot.lane.b32.xlu1 %v213_v25, %s432_s4 }
 0x219   :  { %v219_v28 = vpop.permute.xlu1 %218 }
 0x21a   :  { %v231_v36 = vmul.f32 %v229_v29, %v219_v28 }
 0x21b   :  { %v221_v34 = vpop.permute.xlu0 %220 }
 0x21c   :  { %v236_v41 = vmul.f32 %v234_v33, %v221_v34  ;;  %v233_v44 = vadd.f32 %v231_v36, %v227_v40 }
 0x21d   :  { %v217_v35 = vpop.permute.xlu1 %216 }
 0x21e   :  { %v230_v38 = vmul.f32 %v228_v31, %v217_v35 }
 0x220   :  { %v232_v42 = vadd.f32 %v230_v38, %v226_v37 }
 0x221   :  { %v223_v43 = vpop.permute.xlu1 %222 }
 0x222   :  { %v238_v45 = vadd.f32 %v236_v41, %v232_v42  ;;  %v237_v46 = vmul.f32 %v235_v39, %v223_v43 }
 0x224   :  { %240 = vst [vmem:[#allocation11] sm:$0xff] %v238_v45  ;;  %v239_v47 = vadd.f32 %v237_v46, %v233_v44 }
 0x226   :  { %241 = vst [vmem:[#allocation11 + $0x8] sm:$0xff] %v239_v47 }
 0x227   :  { %407 = shalt.err (!%p404_p1)
}
 0x228   :  { %253 = dma.vmem_to_hbm [thread:$0]  %s248_s28, 256, %s527_s7, [#allocation4], %s426_s29, %s426_s29, %s427_s30  }
 0x229   :  { %422 = dma.done.wait [#allocation4], 256  }
 0x22a   :  { %423 = vsyncadd [#allocation4], 4294967040 }
 0x22b   :  { %257 = vsyncpa [#allocation3], 1 }
 0x22c   :  { %258 = vsyncpa [#allocation6], 1 }
 0x22d   :  { %259 = vsyncpa [#allocation9], 1 }
 0x22e   :  { %260 = vsyncpa [#allocation4], 1 }

</bundles_post_ra>
